<compile_context>
chip_gen: v7x
topology: tpu7x:2x2x1
jax: 0.10.0
libtpu: 0.0.40
codegen_flags: <defaults>
</compile_context>

<pallas_src>
import jax
import jax.numpy as jnp
from jax.experimental import pallas as pl
from jax.experimental.pallas import tpu as pltpu

IN_DIM = 512    # fc1 input dim (CLIP text feature dim)
OUT_DIM = 128   # fc1 output dim


def fc1_kernel(x_ref, w_ref, b_ref, o_ref):
    """One (tm, N) output tile: full-K contraction in a single MXU dot.

    x_ref: (tm, K) bf16, w_ref: (K, N) bf16, b_ref: (1, N) f32, o_ref: (tm, N) f32.
    """
    acc = jnp.dot(x_ref[...], w_ref[...], preferred_element_type=jnp.float32)
    o_ref[...] = acc + b_ref[...]


def prompt_learner_fc1(x, w_t, b):
    """y = x @ w_t + b  (fc1 of PromptLearner).

    x:   [M, K]   (M = n_prompts, K = 512), any float dtype
    w_t: [K, N]   (fc1 weight, already transposed; N = 128)
    b:   [1, N]   bias
    Returns f32 [M, N].
    """
    M, K = x.shape
    Kw, N = w_t.shape
    assert K == Kw and b.shape == (1, N)

    # bf16 MXU operands (f32 accumulation in-kernel); bias/epilogue stay f32.
    x_bf = x.astype(jnp.bfloat16)
    w_bf = w_t.astype(jnp.bfloat16)
    b_f32 = b.astype(jnp.float32)

    # Row-tile size: sublane-aligned, capped at 512 rows. For large M keep at
    # least 2 grid steps so the "parallel" axis can shard across v7x's 2 TCs.
    m_pad8 = 8 * pl.cdiv(M, 8)
    if m_pad8 <= 512:
        tm = m_pad8                      # whole batch in one tile
    else:
        tm = min(512, 8 * pl.cdiv(pl.cdiv(M, 2), 8))

    grid = (pl.cdiv(M, tm),)             # trailing partial block masked by Pallas

    out = pl.pallas_call(
        fc1_kernel,
        out_shape=jax.ShapeDtypeStruct((M, N), jnp.float32),
        grid_spec=pltpu.PrefetchScalarGridSpec(
            num_scalar_prefetch=0,
            grid=grid,
            in_specs=[
                pl.BlockSpec((tm, K), lambda i: (i, 0)),   # x row tile (bf16)
                pl.BlockSpec((K, N), lambda i: (0, 0)),    # full W^T, VMEM-resident
                pl.BlockSpec((1, N), lambda i: (0, 0)),    # bias, fetched once
            ],
            out_specs=pl.BlockSpec((tm, N), lambda i: (i, 0)),
        ),
        compiler_params=pltpu.CompilerParams(
            dimension_semantics=("parallel",)
        ),
        cost_estimate=pl.CostEstimate(
            flops=2 * M * K * N,
            transcendentals=0,
            # bf16 x and W, f32 output + bias.
            bytes_accessed=2 * (M * K + K * N) + 4 * (M * N + N),
        ),
    )(x_bf, w_bf, b_f32)

    return out


if __name__ == "__main__":
    key = jax.random.PRNGKey(0)
    k_feat, k_w, k_b = jax.random.split(key, 3)

    # Synthetic stand-in for clip_model.encode_text(prompts): [n_prompts, 512]
    n_prompts = 8
    text_features = jax.random.normal(k_feat, (n_prompts, IN_DIM), dtype=jnp.float32)

    # Deterministic fc1 = nn.Linear(512, 128) init (PyTorch-style uniform bounds).
    bound = 1.0 / (IN_DIM ** 0.5)
    fc1_weight = jax.random.uniform(
        k_w, (OUT_DIM, IN_DIM), minval=-bound, maxval=bound, dtype=jnp.float32
    )
    fc1_bias = jax.random.uniform(
        k_b, (OUT_DIM,), minval=-bound, maxval=bound, dtype=jnp.float32
    )

    w_t = fc1_weight.T                  # [512, 128]
    b2d = fc1_bias.reshape(1, OUT_DIM)  # [1, 128]

    out = prompt_learner_fc1(text_features, w_t, b2d)
    out = jax.block_until_ready(out)

    # Reference check (plain JAX, f32). bf16 MXU operands over a K=512
    # contraction need a looser tolerance than the previous f32 kernel.
    ref = text_features @ w_t + b2d
    assert out.shape == (n_prompts, OUT_DIM)
    assert out.dtype == jnp.float32
    assert jnp.allclose(out, ref, atol=3e-2, rtol=3e-2), "mismatch vs reference"

    print("KERNEL_OK")
</pallas_src>

<mosaic_0001>
module attributes {stable_mosaic.version = 11 : i64} {
  func.func @fc1_kernel(%arg0: i32, %arg1: memref<8x512xbf16, #tpu.memory_space<vmem>>, %arg2: memref<512x128xbf16, #tpu.memory_space<vmem>>, %arg3: memref<1x128xf32, #tpu.memory_space<vmem>>, %arg4: memref<8x128xf32, #tpu.memory_space<vmem>>) attributes {dimension_semantics = [#tpu.dimension_semantics<parallel>], iteration_bounds = array<i64: 1>, scalar_prefetch = 0 : i64, scratch_operands = 0 : i64, tpu.core_type = #tpu.core_type<tc>, window_params = [{transform_indices = @transform_0, window_bounds = array<i64: 8, 512>}, {pipeline_mode = #tpu.pipeline_mode<synchronous>, transform_indices = @transform_1, window_bounds = array<i64: 512, 128>}, {pipeline_mode = #tpu.pipeline_mode<synchronous>, transform_indices = @transform_2, window_bounds = array<i64: 1, 128>}, {transform_indices = @transform_3, window_bounds = array<i64: 8, 128>}]} {
    %c0 = arith.constant 0 : index
    %c0_0 = arith.constant 0 : index
    %0 = vector.load %arg1[%c0, %c0_0] : memref<8x512xbf16, #tpu.memory_space<vmem>>, vector<8x512xbf16>
    %c0_1 = arith.constant 0 : index
    %c0_2 = arith.constant 0 : index
    %1 = vector.load %arg2[%c0_1, %c0_2] : memref<512x128xbf16, #tpu.memory_space<vmem>>, vector<512x128xbf16>
    %cst = arith.constant dense<0.000000e+00> : vector<8x128xf32>
    %2 = tpu.matmul %0, %1, %cst {dimension_numbers = #tpu.dot_dimension_numbers<[1], [0], [0], [1], [0, 0, 1, 1], [], []>} : vector<8x512xbf16>, vector<512x128xbf16>, vector<8x128xf32> -> vector<8x128xf32>
    %c0_3 = arith.constant 0 : index
    %c0_4 = arith.constant 0 : index
    %3 = vector.load %arg3[%c0_3, %c0_4] : memref<1x128xf32, #tpu.memory_space<vmem>>, vector<1x128xf32>
    %4 = vector.broadcast %3 : vector<1x128xf32> to vector<8x128xf32>
    %5 = arith.addf %2, %4 : vector<8x128xf32>
    %c0_5 = arith.constant 0 : index
    %c0_6 = arith.constant 0 : index
    %6 = vector.load %arg4[%c0_5, %c0_6] : memref<8x128xf32, #tpu.memory_space<vmem>>, vector<8x128xf32>
    tpu.vector_store %arg4[%c0_5, %c0_6], %5 {strides = array<i32>} : memref<8x128xf32, #tpu.memory_space<vmem>>, vector<8x128xf32>,
    return
  }
  func.func @transform_0(%arg0: i32) -> (i32, i32) {
    %c0_i32 = arith.constant 0 : i32
    %c0_i32_0 = arith.constant 0 : i32
    return %arg0, %c0_i32 : i32, i32
  }
  func.func @transform_1(%arg0: i32) -> (i32, i32) {
    %c0_i32 = arith.constant 0 : i32
    %c0_i32_0 = arith.constant 0 : i32
    %c0_i32_1 = arith.constant 0 : i32
    return %c0_i32, %c0_i32_0 : i32, i32
  }
  func.func @transform_2(%arg0: i32) -> (i32, i32) {
    %c0_i32 = arith.constant 0 : i32
    %c0_i32_0 = arith.constant 0 : i32
    %c0_i32_1 = arith.constant 0 : i32
    return %c0_i32, %c0_i32_0 : i32, i32
  }
  func.func @transform_3(%arg0: i32) -> (i32, i32) {
    %c0_i32 = arith.constant 0 : i32
    %c0_i32_0 = arith.constant 0 : i32
    return %arg0, %c0_i32 : i32, i32
  }
}

</mosaic_0001>

<bundles_post_ra>
// kernel: tpu_custom_call.1
= control target key start
LH: loop header
LB: loop body
LE: loop exit
PB: predicated region body
PF: predicated region fallthrough
CT: control target
= control target key end

     0   :  { %8 = vsyncpa [#allocation3], 0  ;;  %s683_s0 = inlined_call_operand.hbm [shape: bf16[8,512], index: 0, kind: input, shape index: {}]   ;;  %s684_s1 = inlined_call_operand.hbm [shape: bf16[512,128], index: 1, kind: input, shape index: {}]   ;;  %s685_s2 = inlined_call_operand.vmem [shape: f32[1,128], index: 2, kind: input, shape index: {}]   ;;  %s686_s3 = inlined_call_operand.hbm [shape: f32[8,128], index: 3, kind: output, shape index: {}]  }
   0x1   :  { %9 = vsyncpa [#allocation6], 0 }
   0x2   :  { %10 = vsyncpa [#allocation4], 0  ;;  %s612_s12 = smov [#allocation2]   ;;  %s613_s14 = smov [#allocation5]  }
   0x3   :  { %s17_s13 = sshll.u32 %s612_s12, 4  ;;  %s26_s15 = sshll.u32 %s613_s14, 4  ;;  %s18_s13 = int_to_ptr.vmem [resolvable:$true] %s17_s13  ;;  %s637_s15 = int_to_ptr.vmem [resolvable:$true] %s26_s15 }
   0x4   :  { %s540_s18 = scalar_lea.hbm %s683_s0, 256 }
   0x5   :  { %p541_p0 = scmp.ne.s32.totalorder %s683_s0, %s540_s18  ;;  %p544_p1 = scmp.lt.u32.totalorder %s540_s18, %s683_s0 }
   0x7   :  { %p546_p2 = pnand %p544_p1, %p541_p0 }
   0x9   :  { %549 = shalt.err (!%p546_p2)
}
   0xa   :  { %s550_s23 = scalar_lea.vmem %s18_s13, 256  ;;  %p555_p4 = scmp.lt.s32.totalorder %s18_s13, %s18_s13 }
   0xb   :  { %p551_p3 = scmp.ne.s32.totalorder %s18_s13, %s550_s23  ;;  %p556_p5 = scmp.lt.s32.totalorder %s550_s23, %s550_s23 }
   0xd   :  { %p557_p6 = por %p556_p5, %p555_p4 }
   0xf   :  { %p558_p7 = pnand %p557_p6, %p551_p3 }
  0x11   :  { %561 = shalt.err (!%p558_p7)
}
  0x12   :  { %20 = dma.hbm_to_vmem [thread:$0]  %s683_s0, 256, %s18_s13, [#allocation3]  }
  0x13   :  { %s562_s28 = scalar_lea.hbm %s684_s1, 4096 }
  0x14   :  { %p563_p8 = scmp.ne.s32.totalorder %s684_s1, %s562_s28  ;;  %p566_p9 = scmp.lt.u32.totalorder %s562_s28, %s684_s1 }
  0x16   :  { %p568_p10 = pnand %p566_p9, %p563_p8 }
  0x18   :  { %571 = shalt.err (!%p568_p10)
}
  0x19   :  { %s572_s6 = scalar_lea.vmem %s637_s15, 4096  ;;  %p577_p12 = scmp.lt.s32.totalorder %s637_s15, %s637_s15 }
  0x1a   :  { %p573_p11 = scmp.ne.s32.totalorder %s637_s15, %s572_s6  ;;  %p578_p13 = scmp.lt.s32.totalorder %s572_s6, %s572_s6 }
  0x1c   :  { %p579_p0 = por %p578_p13, %p577_p12 }
  0x1e   :  { %p580_p1 = pnand %p579_p0, %p573_p11 }
  0x20   :  { %583 = shalt.err (!%p580_p1)
}
  0x21   :  { %s614_s0 = smov 64   ;;  %s615_s7 = smov 4  }
  0x22   :  { %32 = dma.hbm_to_vmem [thread:$0]  %s684_s1, 4096, %s637_s15, [#allocation6], %s614_s0, %s614_s0, %s615_s7  }
  0x23   :  { %606 = dma.done.wait [#allocation3], 256  }
  0x24   :  { %607 = vsyncadd [#allocation3], 4294967040 }
  0x25   :  { %608 = dma.done.wait [#allocation6], 4096  }
  0x26   :  { %609 = vsyncadd [#allocation6], 4294963200  ;;  %v504_v0 = vld [vmem:[#allocation5 + $0x40] sm:$0xff]   ;;  %v508_v4 = vld [vmem:[#allocation5 + $0x48] sm:$0xff]   ;;  %s616_s11 = smov [#allocation7]  }
  0x27   :  { %v505_v1 = vld [vmem:[#allocation5 + $0xc0] sm:$0xff]   ;;  %455 = vmatprep.subr.bf16.mxu0 %v504_v0  ;;  %v509_v5 = vld [vmem:[#allocation5 + $0xc8] sm:$0xff]   ;;  %v512_v8 = vld [vmem:[#allocation5 + $0x50] sm:$0xff]   ;;  %s408_s12 = sshll.u32 %s616_s11, 4  ;;  %s409_s12 = int_to_ptr.vmem [resolvable:$true] %s408_s12 }
  0x28   :  { %v506_v2 = vld [vmem:[#allocation5] sm:$0xff]   ;;  %477 = vmatprep.subr.bf16.mxu1 %v505_v1  ;;  %v510_v6 = vld [vmem:[#allocation5 + $0x8] sm:$0xff]   ;;  %v513_v9 = vld [vmem:[#allocation5 + $0xd0] sm:$0xff]   ;;  %s584_s13 = scalar_lea.vmem %s409_s12, 128  ;;  %p589_p3 = scmp.lt.s32.totalorder %s409_s12, %s409_s12 }
  0x29   :  { %v507_v3 = vld [vmem:[#allocation5 + $0x80] sm:$0xff]   ;;  %456 = vmatpush3.bf16.msra.mxu0 %v506_v2  ;;  %v511_v7 = vld [vmem:[#allocation5 + $0x88] sm:$0xff]   ;;  %v514_v10 = vld [vmem:[#allocation5 + $0x10] sm:$0xff]   ;;  %p585_p2 = scmp.ne.s32.totalorder %s409_s12, %s584_s13  ;;  %p590_p4 = scmp.lt.s32.totalorder %s584_s13, %s584_s13 }
  0x2a   :  { %478 = vmatpush3.bf16.msra.mxu1 %v507_v3  ;;  %457 = vmatprep.subr.bf16.mxu0 %v508_v4  ;;  %v515_v11 = vld [vmem:[#allocation5 + $0x90] sm:$0xff]   ;;  %v516_v12 = vld [vmem:[#allocation5 + $0x58] sm:$0xff]   ;;  %v520_v16 = vld [vmem:[#allocation5 + $0x60] sm:$0xff]  }
  0x2b   :  { %479 = vmatprep.subr.bf16.mxu1 %v509_v5  ;;  %v517_v13 = vld [vmem:[#allocation5 + $0xd8] sm:$0xff]   ;;  %v521_v17 = vld [vmem:[#allocation5 + $0xe0] sm:$0xff]   ;;  %v524_v20 = vld [vmem:[#allocation5 + $0x68] sm:$0xff]   ;;  %p591_p5 = por %p590_p4, %p589_p3 }
  0x2c   :  { %v518_v14 = vld [vmem:[#allocation5 + $0x18] sm:$0xff]   ;;  %v522_v18 = vld [vmem:[#allocation5 + $0x20] sm:$0xff]   ;;  %v525_v21 = vld [vmem:[#allocation5 + $0xe8] sm:$0xff]  }
  0x2d   :  { %458 = vmatpush3.bf16.msra.mxu0 %v510_v6  ;;  %v519_v15 = vld [vmem:[#allocation5 + $0x98] sm:$0xff]   ;;  %v523_v19 = vld [vmem:[#allocation5 + $0xa0] sm:$0xff]   ;;  %v526_v22 = vld [vmem:[#allocation5 + $0x28] sm:$0xff]   ;;  %p592_p6 = pnand %p591_p5, %p585_p2 }
  0x2e   :  { %480 = vmatpush3.bf16.msra.mxu1 %v511_v7  ;;  %459 = vmatprep.subr.bf16.mxu0 %v512_v8  ;;  %v527_v23 = vld [vmem:[#allocation5 + $0xa8] sm:$0xff]   ;;  %v528_v24 = vld [vmem:[#allocation5 + $0x70] sm:$0xff]   ;;  %v532_v28 = vld [vmem:[#allocation5 + $0x78] sm:$0xff]  }
  0x2f   :  { %481 = vmatprep.subr.bf16.mxu1 %v513_v9  ;;  %v529_v25 = vld [vmem:[#allocation5 + $0xf0] sm:$0xff]   ;;  %v533_v29 = vld [vmem:[#allocation5 + $0xf8] sm:$0xff]  }
  0x30   :  { %v530_v26 = vld [vmem:[#allocation5 + $0x30] sm:$0xff]   ;;  %v534_v30 = vld [vmem:[#allocation5 + $0x38] sm:$0xff]  }
  0x31   :  { %460 = vmatpush3.bf16.msra.mxu0 %v514_v10  ;;  %v531_v27 = vld [vmem:[#allocation5 + $0xb0] sm:$0xff]   ;;  %v535_v31 = vld [vmem:[#allocation5 + $0xb8] sm:$0xff]  }
  0x32   :  { %482 = vmatpush3.bf16.msra.mxu1 %v515_v11  ;;  %461 = vmatprep.subr.bf16.mxu0 %v516_v12  ;;  %v42_v32 = vld [vmem:[#allocation2] sm:$0xff]  ;;  %v43_v33 = vld [vmem:[#allocation2 + $0x8] sm:$0xff] }
  0x33   :  { %483 = vmatprep.subr.bf16.mxu1 %v517_v13  ;;  %v419_v34 = vcombine.low %v42_v32, %v42_v32  ;;  %v420_v35 = vcombine.high %v42_v32, %v42_v32  ;;  %v421_v36 = vcombine.low %v43_v33, %v43_v33  ;;  %v422_v37 = vcombine.high %v43_v33, %v43_v33  ;;  %v418_v40 = vld [vmem:[%s685_s2] ss:$0 sm:$0xff] }
  0x35   :  { %462 = vmatpush3.bf16.msra.mxu0 %v518_v14  ;;  %353 = vmatprep.mubr.bf16.mxu0 %v420_v35 }
  0x36   :  { %484 = vmatpush3.bf16.msra.mxu1 %v519_v15  ;;  %463 = vmatprep.subr.bf16.mxu0 %v520_v16 }
  0x37   :  { %485 = vmatprep.subr.bf16.mxu1 %v521_v17  ;;  %393 = vmatprep.mubr.bf16.mxu1 %v422_v37 }
  0x39   :  { %464 = vmatpush3.bf16.msra.mxu0 %v522_v18 }
  0x3a   :  { %486 = vmatpush3.bf16.msra.mxu1 %v523_v19  ;;  %465 = vmatprep.subr.bf16.mxu0 %v524_v20 }
  0x3b   :  { %487 = vmatprep.subr.bf16.mxu1 %v525_v21 }
  0x3d   :  { %466 = vmatpush3.bf16.msra.mxu0 %v526_v22 }
  0x3e   :  { %488 = vmatpush3.bf16.msra.mxu1 %v527_v23  ;;  %467 = vmatprep.subr.bf16.mxu0 %v528_v24 }
  0x3f   :  { %489 = vmatprep.subr.bf16.mxu1 %v529_v25 }
  0x41   :  { %468 = vmatpush3.bf16.msra.mxu0 %v530_v26 }
  0x42   :  { %490 = vmatpush3.bf16.msra.mxu1 %v531_v27  ;;  %469 = vmatprep.subr.bf16.mxu0 %v532_v28 }
  0x43   :  { %491 = vmatprep.subr.bf16.mxu1 %v533_v29 }
  0x45   :  { %470 = vmatpush3.bf16.msra.mxu0 %v534_v30 }
  0x46   :  { %492 = vmatpush3.bf16.msra.mxu1 %v535_v31 }
  0x48   :  { %354 = vmatmul.mubr.bf16.vlgmr.msra.gmra.mrb[0].mxu0 %v419_v34 }
  0x49   :  { %394 = vmatmul.mubr.bf16.vlgmr.msra.gmra.mrb[0].mxu1 %v421_v36 }
 0x11b   :  { %v471_v38 = vpop.f32.mrb[0].mxu0 }
 0x11c   :  { %v493_v39 = vpop.f32.mrb[0].mxu1  ;;  %v472_v41 = vpop.f32.mrb[1].mxu0 }
 0x11d   :  { %v494_v42 = vpop.f32.mrb[1].mxu1  ;;  %v473_v43 = vadd.f32 %v472_v41, %v471_v38  ;;  %v474_v45 = vpop.f32.mrb[2].mxu0 }
 0x11e   :  { %v495_v44 = vadd.f32 %v494_v42, %v493_v39  ;;  %v496_v46 = vpop.f32.mrb[2].mxu1  ;;  %v475_v47 = vpop.f32.mrb[3].mxu0 }
 0x11f   :  { %v497_v48 = vpop.f32.mrb[3].mxu1  ;;  %v356_v49 = vadd.f32 %v473_v43, %v418_v40 }
 0x121   :  { %v396_v50 = vadd.f32 %v495_v44, %v356_v49 }
 0x123   :  { %401 = vst [vmem:[#allocation7] sm:$0xff] %v396_v50 }
 0x124   :  { %595 = shalt.err (!%p592_p6)
}
 0x125   :  { %s596_s15 = scalar_lea.hbm %s686_s3, 128 }
 0x126   :  { %p597_p7 = scmp.ne.s32.totalorder %s686_s3, %s596_s15  ;;  %p600_p8 = scmp.lt.u32.totalorder %s596_s15, %s686_s3 }
 0x128   :  { %p602_p9 = pnand %p600_p8, %p597_p7 }
 0x12a   :  { %605 = shalt.err (!%p602_p9)
}
 0x12b   :  { %411 = dma.vmem_to_hbm [thread:$0]  %s409_s12, 128, %s686_s3, [#allocation4]  }
 0x12c   :  { %610 = dma.done.wait [#allocation4], 128  }
 0x12d   :  { %611 = vsyncadd [#allocation4], 4294967168 }
 0x12e   :  { %415 = vsyncpa [#allocation3], 1 }
 0x12f   :  { %416 = vsyncpa [#allocation6], 1 }
 0x130   :  { %417 = vsyncpa [#allocation4], 1 }

</bundles_post_ra>
